<compile_context>
chip_gen: v6e
topology: v6e:2x2x1
jax: 0.10.0
libtpu: 0.0.40
codegen_flags: <defaults>
</compile_context>

<pallas_src>
import functools

import jax
import jax.numpy as jnp
from jax.experimental import pallas as pl
from jax.experimental.pallas import tpu as pltpu

_LANE = 128
_SUBLANE = 8


def _round_up(x, m):
    return (x + m - 1) // m * m


def _cdiv(a, b):
    return (a + b - 1) // b


def _choose_tiling(m, cap=1024, split_threshold=512):
    """Balanced batch tiles.

    - padding bounded by (SUBLANE-1) rows per step (no up-to-2x blowup),
    - >=2 grid steps once M is large so dimension_semantics=("parallel",)
      can shard the batch across v7x's two TensorCores,
    - tiles up to 1024 rows on single-TC chips to amortize per-step overhead.
    """
    n_steps = max(1, _cdiv(m, cap))
    if m >= split_threshold and n_steps < 2:
        n_steps = 2
    tm = _round_up(_cdiv(m, n_steps), _SUBLANE)
    m_pad = n_steps * tm
    return tm, m_pad, n_steps


# ----------------------------------------------------------------------------
# Fused MLP kernel: x -> [Linear(+ReLU)]*L, packing selected layer outputs
# into one lane-dense output block.
# refs = [x, w0, b0, w1, b1, ..., packed_out]
# ----------------------------------------------------------------------------
def _fused_mlp_kernel(*refs, relu_flags, out_slots, pack_width):
    num_layers = len(relu_flags)
    x_ref = refs[0]
    wb_refs = refs[1:1 + 2 * num_layers]
    out_ref = refs[1 + 2 * num_layers]

    slot_map = {l: (off, w) for l, off, w in out_slots}
    tail_start = max(off + w for _, off, w in out_slots)

    h = x_ref[...]
    for l in range(num_layers):
        w_ref = wb_refs[2 * l]
        b_ref = wb_refs[2 * l + 1]
        # bf16 MXU operands, f32 accumulation; bias-add / ReLU stay in f32.
        h = jnp.dot(h.astype(jnp.bfloat16), w_ref[...],
                    preferred_element_type=jnp.float32)
        h = h + b_ref[...]
        if relu_flags[l]:
            h = jnp.maximum(h, 0.0)
        if l in slot_map:
            off, width = slot_map[l]
            out_ref[:, off:off + width] = h[:, :width].astype(out_ref.dtype)

    # Zero the unused tail lanes so the HBM output is fully deterministic.
    if tail_start < pack_width:
        out_ref[:, tail_start:] = jnp.zeros(
            (out_ref.shape[0], pack_width - tail_start), out_ref.dtype)


def _fused_mlp_forward(relu_flags, out_slots, pack_width, x, *padded_params):
    """One pallas_call for the whole MLP; returns per-layer output slices."""
    M, K0 = x.shape

    tm, M_pad, n_steps = _choose_tiling(M)
    if M_pad != M:
        x = jnp.pad(x, ((0, M_pad - M), (0, 0)))

    # Tile only the batch axis; weights/biases stay VMEM-resident blocks.
    in_specs = [pl.BlockSpec((tm, K0), lambda i: (i, 0))]
    for p in padded_params:
        in_specs.append(pl.BlockSpec(p.shape, lambda i: (0, 0)))

    kernel = functools.partial(_fused_mlp_kernel,
                               relu_flags=relu_flags,
                               out_slots=out_slots,
                               pack_width=pack_width)

    packed = pl.pallas_call(
        kernel,
        out_shape=jax.ShapeDtypeStruct((M_pad, pack_width), jnp.float32),
        grid_spec=pltpu.PrefetchScalarGridSpec(
            num_scalar_prefetch=0,
            grid=(n_steps,),
            in_specs=in_specs,
            out_specs=pl.BlockSpec((tm, pack_width), lambda i: (i, 0)),
        ),
        compiler_params=pltpu.CompilerParams(
            dimension_semantics=("parallel",)),
    )(x, *padded_params)

    # Split the single packed lane-dense buffer back into real widths
    # (small slices over one buffer; batch/lane padding discarded here).
    return tuple(packed[:M, off:off + w] for _, off, w in out_slots)


# ----------------------------------------------------------------------------
# BasicModel equivalent
# ----------------------------------------------------------------------------
class BasicModelPallas:
    """Mirrors BasicModel.__init__ / .forward control flow.

    module_list entries: ("linear_relu", param_name) or ("linear", param_name)
    (the "_relu" variant corresponds to nn.Sequential(Linear, ReLU)).
    """

    def __init__(self, module_list, outputs, params):
        self.module_list = list(module_list)
        self.params = params
        # Exact replication of BasicModel.__init__ output-index trimming.
        if len(outputs) < 1 or outputs[-1] != len(module_list) - 1:
            self.outputs = list(outputs)
        else:
            self.outputs = list(outputs[:-1])
        self.context = None
        # TODO(synk): nn.RNNBase / SumLayer / ConcatLayer branches of
        # BasicModel.forward are not exercised by this module_list.

        num_layers = len(self.module_list)
        relu_flags = tuple(kind == "linear_relu" for kind, _ in self.module_list)
        # Layers whose activations must leave the kernel: requested
        # intermediate outputs plus the final layer.
        out_layers = tuple(sorted(set(self.outputs) | {num_layers - 1}))

        # Pad every layer's output width to a multiple of 128 lanes so the
        # activation chain stays lane-dense.  Zero padding is exact
        # (relu(0)=0, zero weight rows/cols contribute nothing).  Weights are
        # pre-cast to bf16 (MXU operands); biases stay f32.
        padded = []
        prev_out_pad = None
        for kind, pname in self.module_list:
            w, b = params[pname]
            k, n = w.shape
            k_pad = k if prev_out_pad is None else prev_out_pad
            n_pad = _round_up(n, _LANE)
            w_p = jnp.zeros((k_pad, n_pad), jnp.bfloat16)
            w_p = w_p.at[:k, :n].set(w.astype(jnp.bfloat16))
            b_p = jnp.zeros((1, n_pad), jnp.float32)
            b_p = b_p.at[0, :n].set(b.astype(jnp.float32))
            padded.extend([w_p, b_p])
            prev_out_pad = n_pad
        self._padded_params = tuple(padded)

        # Pack every requested layer output into ONE lane-dense output block:
        # layer l occupies lanes [off, off+width).
        out_slots = []
        off = 0
        for l in out_layers:
            width = params[self.module_list[l][1]][0].shape[1]
            out_slots.append((l, off, width))
            off += width
        pack_width = _round_up(off, _LANE)

        self._out_layers = out_layers
        self._out_slots = tuple(out_slots)

        # Single jitted program: one fused pallas_call + output splitting.
        self._forward = jax.jit(functools.partial(
            _fused_mlp_forward, relu_flags, self._out_slots, pack_width))

    def __call__(self, x):
        fused_outs = self._forward(x, *self._padded_params)
        by_layer = {l: o for (l, _, _), o in zip(self._out_slots, fused_outs)}

        # Replicate BasicModel.forward output-collection semantics.
        outs = []
        j = 0
        sz = len(self.outputs)
        for i in range(len(self.module_list)):
            if j < sz:
                if i == self.outputs[j]:
                    outs.append(by_layer[i])
                    j += 1
                elif i < self.outputs[j]:
                    pass
                else:
                    raise Exception(f"How can we skip an output layer {j}?")
        final = by_layer[len(self.module_list) - 1]
        if len(outs) < 1:
            return final
        outs.append(final)
        return outs


# Pure-JAX f32 reference for correctness checking.
def _reference_forward(module_list, outputs_trimmed, params, x):
    outs = []
    for i, (kind, pname) in enumerate(module_list):
        w, b = params[pname]
        x = x @ w + b[None, :]
        if kind == "linear_relu":
            x = jnp.maximum(x, 0.0)
        if i in outputs_trimmed:
            outs.append(x)
    if len(outs) < 1:
        return x
    outs.append(x)
    return outs


if __name__ == "__main__":
    key = jax.random.PRNGKey(0)
    batch, d_in, d_hidden, n_classes = 8, 32, 64, 10
    k0, k1, k2, kx = jax.random.split(key, 4)

    # init_params(initrange=0.01): small uniform weights, zero biases.
    initrange = 0.01
    params = {
        "fc0": (jax.random.uniform(k0, (d_in, d_hidden), jnp.float32,
                                   -initrange, initrange),
                jnp.zeros((d_hidden,), jnp.float32)),
        "fc1": (jax.random.uniform(k1, (d_hidden, d_hidden), jnp.float32,
                                   -initrange, initrange),
                jnp.zeros((d_hidden,), jnp.float32)),
        "fc2": (jax.random.uniform(k2, (d_hidden, n_classes), jnp.float32,
                                   -initrange, initrange),
                jnp.zeros((n_classes,), jnp.float32)),
    }

    module_list = [("linear_relu", "fc0"),
                   ("linear_relu", "fc1"),
                   ("linear", "fc2")]
    outputs = [1, 2]  # trimmed to [1] by __init__ (2 == len(module_list)-1)

    model = BasicModelPallas(module_list, outputs, params)

    x = jax.random.normal(kx, (batch, d_in), jnp.float32)

    result = model(x)
    result = [jax.block_until_ready(r) for r in result]

    # Sanity check against pure-JAX f32 reference (tolerances loosened for
    # the bf16 MXU-operand cast).
    ref = _reference_forward(module_list, model.outputs, params, x)
    assert len(result) == len(ref) == 2
    for got, want in zip(result, ref):
        assert got.shape == want.shape, (got.shape, want.shape)
        assert jnp.allclose(got, want, atol=5e-3, rtol=2e-2), (
            float(jnp.max(jnp.abs(got - want))))

    print("KERNEL_OK")
</pallas_src>

<mosaic_0001>
module attributes {stable_mosaic.version = 11 : i64} {
  func.func @_fused_mlp_kernel(%arg0: i32, %arg1: memref<8x32xf32, #tpu.memory_space<vmem>>, %arg2: memref<32x128xbf16, #tpu.memory_space<vmem>>, %arg3: memref<1x128xf32, #tpu.memory_space<vmem>>, %arg4: memref<128x128xbf16, #tpu.memory_space<vmem>>, %arg5: memref<1x128xf32, #tpu.memory_space<vmem>>, %arg6: memref<128x128xbf16, #tpu.memory_space<vmem>>, %arg7: memref<1x128xf32, #tpu.memory_space<vmem>>, %arg8: memref<8x128xf32, #tpu.memory_space<vmem>>) attributes {dimension_semantics = [#tpu.dimension_semantics<parallel>], iteration_bounds = array<i64: 1>, scalar_prefetch = 0 : i64, scratch_operands = 0 : i64, tpu.core_type = #tpu.core_type<tc>, window_params = [{transform_indices = @transform_0, window_bounds = array<i64: 8, 32>}, {pipeline_mode = #tpu.pipeline_mode<synchronous>, transform_indices = @transform_1, window_bounds = array<i64: 32, 128>}, {pipeline_mode = #tpu.pipeline_mode<synchronous>, transform_indices = @transform_2, window_bounds = array<i64: 1, 128>}, {pipeline_mode = #tpu.pipeline_mode<synchronous>, transform_indices = @transform_3, window_bounds = array<i64: 128, 128>}, {pipeline_mode = #tpu.pipeline_mode<synchronous>, transform_indices = @transform_4, window_bounds = array<i64: 1, 128>}, {pipeline_mode = #tpu.pipeline_mode<synchronous>, transform_indices = @transform_5, window_bounds = array<i64: 128, 128>}, {pipeline_mode = #tpu.pipeline_mode<synchronous>, transform_indices = @transform_6, window_bounds = array<i64: 1, 128>}, {transform_indices = @transform_7, window_bounds = array<i64: 8, 128>}]} {
    %c0 = arith.constant 0 : index
    %c0_0 = arith.constant 0 : index
    %0 = vector.load %arg1[%c0, %c0_0] : memref<8x32xf32, #tpu.memory_space<vmem>>, vector<8x32xf32>
    %1 = arith.truncf %0 : vector<8x32xf32> to vector<8x32xbf16>
    %c0_1 = arith.constant 0 : index
    %c0_2 = arith.constant 0 : index
    %2 = vector.load %arg2[%c0_1, %c0_2] : memref<32x128xbf16, #tpu.memory_space<vmem>>, vector<32x128xbf16>
    %cst = arith.constant dense<0.000000e+00> : vector<8x128xf32>
    %3 = tpu.matmul %1, %2, %cst {dimension_numbers = #tpu.dot_dimension_numbers<[1], [0], [0], [1], [0, 0, 1, 1], [], []>} : vector<8x32xbf16>, vector<32x128xbf16>, vector<8x128xf32> -> vector<8x128xf32>
    %c0_3 = arith.constant 0 : index
    %c0_4 = arith.constant 0 : index
    %4 = vector.load %arg3[%c0_3, %c0_4] : memref<1x128xf32, #tpu.memory_space<vmem>>, vector<1x128xf32>
    %5 = vector.broadcast %4 : vector<1x128xf32> to vector<8x128xf32>
    %6 = arith.addf %3, %5 : vector<8x128xf32>
    %cst_5 = arith.constant 0.000000e+00 : f32
    %7 = vector.broadcast %cst_5 : f32 to vector<8x128xf32>
    %8 = arith.maximumf %6, %7 : vector<8x128xf32>
    %9 = arith.truncf %8 : vector<8x128xf32> to vector<8x128xbf16>
    %c0_6 = arith.constant 0 : index
    %c0_7 = arith.constant 0 : index
    %10 = vector.load %arg4[%c0_6, %c0_7] : memref<128x128xbf16, #tpu.memory_space<vmem>>, vector<128x128xbf16>
    %cst_8 = arith.constant dense<0.000000e+00> : vector<8x128xf32>
    %11 = tpu.matmul %9, %10, %cst_8 {dimension_numbers = #tpu.dot_dimension_numbers<[1], [0], [0], [1], [0, 0, 1, 1], [], []>} : vector<8x128xbf16>, vector<128x128xbf16>, vector<8x128xf32> -> vector<8x128xf32>
    %c0_9 = arith.constant 0 : index
    %c0_10 = arith.constant 0 : index
    %12 = vector.load %arg5[%c0_9, %c0_10] : memref<1x128xf32, #tpu.memory_space<vmem>>, vector<1x128xf32>
    %13 = vector.broadcast %12 : vector<1x128xf32> to vector<8x128xf32>
    %14 = arith.addf %11, %13 : vector<8x128xf32>
    %cst_11 = arith.constant 0.000000e+00 : f32
    %15 = vector.broadcast %cst_11 : f32 to vector<8x128xf32>
    %16 = arith.maximumf %14, %15 : vector<8x128xf32>
    %17 = vector.extract_strided_slice %16 {offsets = [0, 0], sizes = [8, 64], strides = [1, 1]} : vector<8x128xf32> to vector<8x64xf32>
    %c0_12 = arith.constant 0 : index
    %c0_13 = arith.constant 0 : index
    %18 = vector.load %arg8[%c0_12, %c0_13] : memref<8x128xf32, #tpu.memory_space<vmem>>, vector<8x64xf32>
    tpu.vector_store %arg8[%c0_12, %c0_13], %17 {strides = array<i32>} : memref<8x128xf32, #tpu.memory_space<vmem>>, vector<8x64xf32>,
    %19 = arith.truncf %16 : vector<8x128xf32> to vector<8x128xbf16>
    %c0_14 = arith.constant 0 : index
    %c0_15 = arith.constant 0 : index
    %20 = vector.load %arg6[%c0_14, %c0_15] : memref<128x128xbf16, #tpu.memory_space<vmem>>, vector<128x128xbf16>
    %cst_16 = arith.constant dense<0.000000e+00> : vector<8x128xf32>
    %21 = tpu.matmul %19, %20, %cst_16 {dimension_numbers = #tpu.dot_dimension_numbers<[1], [0], [0], [1], [0, 0, 1, 1], [], []>} : vector<8x128xbf16>, vector<128x128xbf16>, vector<8x128xf32> -> vector<8x128xf32>
    %c0_17 = arith.constant 0 : index
    %c0_18 = arith.constant 0 : index
    %22 = vector.load %arg7[%c0_17, %c0_18] : memref<1x128xf32, #tpu.memory_space<vmem>>, vector<1x128xf32>
    %23 = vector.broadcast %22 : vector<1x128xf32> to vector<8x128xf32>
    %24 = arith.addf %21, %23 : vector<8x128xf32>
    %25 = vector.extract_strided_slice %24 {offsets = [0, 0], sizes = [8, 10], strides = [1, 1]} : vector<8x128xf32> to vector<8x10xf32>
    %c0_19 = arith.constant 0 : index
    %c64 = arith.constant 64 : index
    %26 = vector.load %arg8[%c0_19, %c64] : memref<8x128xf32, #tpu.memory_space<vmem>>, vector<8x10xf32>
    tpu.vector_store %arg8[%c0_19, %c64], %25 {strides = array<i32>} : memref<8x128xf32, #tpu.memory_space<vmem>>, vector<8x10xf32>,
    %cst_20 = arith.constant 0.000000e+00 : f32
    %27 = vector.broadcast %cst_20 : f32 to vector<8x54xf32>
    %c0_21 = arith.constant 0 : index
    %c74 = arith.constant 74 : index
    %28 = vector.load %arg8[%c0_21, %c74] : memref<8x128xf32, #tpu.memory_space<vmem>>, vector<8x54xf32>
    tpu.vector_store %arg8[%c0_21, %c74], %27 {strides = array<i32>} : memref<8x128xf32, #tpu.memory_space<vmem>>, vector<8x54xf32>,
    return
  }
  func.func @transform_0(%arg0: i32) -> (i32, i32) {
    %c0_i32 = arith.constant 0 : i32
    %c0_i32_0 = arith.constant 0 : i32
    return %arg0, %c0_i32 : i32, i32
  }
  func.func @transform_1(%arg0: i32) -> (i32, i32) {
    %c0_i32 = arith.constant 0 : i32
    %c0_i32_0 = arith.constant 0 : i32
    %c0_i32_1 = arith.constant 0 : i32
    return %c0_i32, %c0_i32_0 : i32, i32
  }
  func.func @transform_2(%arg0: i32) -> (i32, i32) {
    %c0_i32 = arith.constant 0 : i32
    %c0_i32_0 = arith.constant 0 : i32
    %c0_i32_1 = arith.constant 0 : i32
    return %c0_i32, %c0_i32_0 : i32, i32
  }
  func.func @transform_3(%arg0: i32) -> (i32, i32) {
    %c0_i32 = arith.constant 0 : i32
    %c0_i32_0 = arith.constant 0 : i32
    %c0_i32_1 = arith.constant 0 : i32
    return %c0_i32, %c0_i32_0 : i32, i32
  }
  func.func @transform_4(%arg0: i32) -> (i32, i32) {
    %c0_i32 = arith.constant 0 : i32
    %c0_i32_0 = arith.constant 0 : i32
    %c0_i32_1 = arith.constant 0 : i32
    return %c0_i32, %c0_i32_0 : i32, i32
  }
  func.func @transform_5(%arg0: i32) -> (i32, i32) {
    %c0_i32 = arith.constant 0 : i32
    %c0_i32_0 = arith.constant 0 : i32
    %c0_i32_1 = arith.constant 0 : i32
    return %c0_i32, %c0_i32_0 : i32, i32
  }
  func.func @transform_6(%arg0: i32) -> (i32, i32) {
    %c0_i32 = arith.constant 0 : i32
    %c0_i32_0 = arith.constant 0 : i32
    %c0_i32_1 = arith.constant 0 : i32
    return %c0_i32, %c0_i32_0 : i32, i32
  }
  func.func @transform_7(%arg0: i32) -> (i32, i32) {
    %c0_i32 = arith.constant 0 : i32
    %c0_i32_0 = arith.constant 0 : i32
    return %arg0, %c0_i32 : i32, i32
  }
}

</mosaic_0001>

<bundles_post_ra>
// kernel: _fused_mlp_forward.1
= control target key start
LH: loop header
LB: loop body
LE: loop exit
PB: predicated region body
PF: predicated region fallthrough
CT: control target
= control target key end

     0   :  { %12 = vsyncpa [#allocation3], 0  ;;  %s708_s0 = inlined_call_operand.hbm [shape: f32[8,32], index: 0, kind: input, shape index: {}]   ;;  %s709_s1 = inlined_call_operand.hbm [shape: bf16[32,128], index: 1, kind: input, shape index: {}]   ;;  %s710_s2 = inlined_call_operand.vmem [shape: f32[1,128], index: 2, kind: input, shape index: {}]   ;;  %s711_s3 = inlined_call_operand.hbm [shape: bf16[128,128], index: 3, kind: input, shape index: {}]   ;;  %s712_s4 = inlined_call_operand.vmem [shape: f32[1,128], index: 4, kind: input, shape index: {}]   ;;  %s713_s5 = inlined_call_operand.hbm [shape: bf16[128,128], index: 5, kind: input, shape index: {}]   ;;  %s714_s6 = inlined_call_operand.vmem [shape: f32[1,128], index: 6, kind: input, shape index: {}]   ;;  %s715_s7 = inlined_call_operand.vmem [shape: f32[8,128], index: 7, kind: output, shape index: {}]  }
   0x1   :  { %13 = vsyncpa [#allocation5], 0 }
   0x2   :  { %14 = vsyncpa [#allocation8], 0  ;;  %s595_s24 = smov [#allocation4]  }
   0x3   :  { %s30_s25 = sshll.u32 %s595_s24, 4  ;;  %s31_s25 = int_to_ptr.vmem [resolvable:$true] %s30_s25 }
   0x4   :  { %s517_s26 = scalar_lea.vmem %s31_s25, 256  ;;  %p522_p1 = scmp.lt.s32.totalorder %s31_s25, %s31_s25 }
   0x5   :  { %p518_p0 = scmp.ne.s32.totalorder %s31_s25, %s517_s26  ;;  %p523_p2 = scmp.lt.s32.totalorder %s517_s26, %s517_s26 }
   0x7   :  { %p524_p3 = por %p523_p2, %p522_p1 }
   0x9   :  { %p525_p4 = pnand %p524_p3, %p518_p0 }
   0xb   :  { %528 = shalt.err (!%p525_p4)
}
   0xc   :  { %s596_s27 = smov 64   ;;  %s597_s28 = smov 4  }
   0xd   :  { %36 = dma.hbm_to_vmem [thread:$0]  %s709_s1, 256, %s31_s25, [#allocation5], %s596_s27, %s596_s27, %s597_s28  }
   0xe   :  { %s598_s8 = smov [#allocation2]   ;;  %s599_s10 = smov [#allocation6]  }
   0xf   :  { %s21_s9 = sshll.u32 %s598_s8, 4  ;;  %s44_s11 = sshll.u32 %s599_s10, 4  ;;  %s22_s9 = int_to_ptr.vmem [resolvable:$true] %s21_s9  ;;  %s45_s11 = int_to_ptr.vmem [resolvable:$true] %s44_s11 }
  0x10   :  { %s537_s12 = scalar_lea.vmem %s22_s9, 128  ;;  %p542_p6 = scmp.lt.s32.totalorder %s22_s9, %s22_s9 }
  0x11   :  { %p538_p5 = scmp.ne.s32.totalorder %s22_s9, %s537_s12  ;;  %p543_p7 = scmp.lt.s32.totalorder %s537_s12, %s537_s12 }
  0x13   :  { %p544_p8 = por %p543_p7, %p542_p6 }
  0x15   :  { %p545_p9 = pnand %p544_p8, %p538_p5 }
  0x17   :  { %548 = shalt.err (!%p545_p9)
}
  0x18   :  { %24 = dma.hbm_to_vmem [thread:$0]  %s708_s0, 128, %s22_s9, [#allocation3]  }
  0x19   :  { %s557_s15 = scalar_lea.vmem %s45_s11, 1024  ;;  %p562_p11 = scmp.lt.s32.totalorder %s45_s11, %s45_s11 }
  0x1a   :  { %p558_p10 = scmp.ne.s32.totalorder %s45_s11, %s557_s15  ;;  %p563_p12 = scmp.lt.s32.totalorder %s557_s15, %s557_s15 }
  0x1c   :  { %p564_p13 = por %p563_p12, %p562_p11 }
  0x1e   :  { %p565_p0 = pnand %p564_p13, %p558_p10 }
  0x20   :  { %568 = shalt.err (!%p565_p0)
}
  0x21   :  { %50 = dma.hbm_to_vmem [thread:$0]  %s711_s3, 1024, %s45_s11, [#allocation5], %s596_s27, %s596_s27, %s597_s28  }
  0x22   :  { %s600_s17 = smov [#allocation7]  }
  0x23   :  { %s58_s18 = sshll.u32 %s600_s17, 4  ;;  %s59_s18 = int_to_ptr.vmem [resolvable:$true] %s58_s18 }
  0x24   :  { %s577_s19 = scalar_lea.vmem %s59_s18, 1024  ;;  %p582_p2 = scmp.lt.s32.totalorder %s59_s18, %s59_s18 }
  0x25   :  { %p578_p1 = scmp.ne.s32.totalorder %s59_s18, %s577_s19  ;;  %p583_p3 = scmp.lt.s32.totalorder %s577_s19, %s577_s19 }
  0x27   :  { %p584_p4 = por %p583_p3, %p582_p2 }
  0x29   :  { %p585_p5 = pnand %p584_p4, %p578_p1 }
  0x2b   :  { %588 = shalt.err (!%p585_p5)
}
  0x2c   :  { %64 = dma.hbm_to_vmem [thread:$0]  %s713_s5, 1024, %s59_s18, [#allocation8], %s596_s27, %s596_s27, %s597_s28  }
  0x2d   :  { %589 = dma.done.wait [#allocation3], 128  }
  0x2e   :  { %590 = vsyncadd [#allocation3], 4294967168 }
  0x2f   :  { %591 = dma.done.wait [#allocation5], 1280  }
  0x30   :  { %592 = vsyncadd [#allocation5], 4294966016 }
  0x31   :  { %593 = dma.done.wait [#allocation8], 1024  }
  0x32   :  { %594 = vsyncadd [#allocation8], 4294966272  ;;  %v601_v0 = vmov 0.0   ;;  %vm602_vm0 = vmmov 0   ;;  %v491_v1 = vld [vmem:[#allocation4 + $0x8] sm:$0xff]   ;;  %v492_v2 = vld [vmem:[#allocation4] sm:$0xff]  }
  0x33   :  { %435 = vmatprep.subr.bf16.mxu0 %v601_v0  ;;  %439 = vmatprep.mubr.msk.bf16.mxu0 %vm602_vm0, %v601_v0  ;;  %v80_v3 = vld [vmem:[#allocation2] sm:$0xff]  ;;  %v493_v4 = vld [vmem:[#allocation6 + $0x38] sm:$0xff]   ;;  %v494_v6 = vld [vmem:[#allocation6 + $0x30] sm:$0xff]   ;;  %vm105_vm1 = vcmask 261120   ;;  %vm263_vm2 = vcmask 523264   ;;  %vm381_vm3 = vcmask 605696  }
  0x34   :  { %443 = vmatprep.subr.bf16.mxu1 %v601_v0  ;;  %459 = vmatprep.mubr.msk.bf16.mxu1 %vm602_vm0, %v601_v0  ;;  %v81_v5 = vpack.c.bf16 %v80_v3, %v80_v3  ;;  %v495_v7 = vld [vmem:[#allocation6 + $0x28] sm:$0xff]   ;;  %v496_v8 = vld [vmem:[#allocation6 + $0x20] sm:$0xff]   ;;  %v497_v9 = vld [vmem:[#allocation6 + $0x18] sm:$0xff]   ;;  %vm383_vm4 = vcmask 1048144  }
  0x35   :  { %436 = vmatpush3.bf16.msra.mxu0 %v491_v1  ;;  %444 = vmatpush3.bf16.msra.mxu1 %v493_v4  ;;  %v498_v10 = vld [vmem:[#allocation6 + $0x10] sm:$0xff]   ;;  %v499_v11 = vld [vmem:[#allocation6 + $0x8] sm:$0xff]   ;;  %v500_v12 = vld [vmem:[#allocation6] sm:$0xff]  }
  0x36   :  { %437 = vmatprep.subr.bf16.mxu0 %v601_v0  ;;  %445 = vmatprep.subr.bf16.mxu1 %v601_v0  ;;  %v501_v13 = vld [vmem:[#allocation7 + $0x38] sm:$0xff]   ;;  %v502_v14 = vld [vmem:[#allocation7 + $0x30] sm:$0xff]   ;;  %v503_v15 = vld [vmem:[#allocation7 + $0x28] sm:$0xff]  }
  0x37   :  { %v504_v16 = vld [vmem:[#allocation7 + $0x20] sm:$0xff]   ;;  %v505_v17 = vld [vmem:[#allocation7 + $0x18] sm:$0xff]   ;;  %v506_v18 = vld [vmem:[#allocation7 + $0x10] sm:$0xff]  }
  0x38   :  { %v392_v19 = vld [vmem:[%s710_s2] ss:$0 sm:$0xff]  ;;  %v508_v28 = vld [vmem:[#allocation7] sm:$0xff]  }
  0x39   :  { %438 = vmatpush3.bf16.msra.mxu0 %v492_v2  ;;  %446 = vmatpush3.bf16.msra.mxu1 %v494_v6  ;;  %v507_v27 = vld [vmem:[#allocation7 + $0x8] sm:$0xff]  }
  0x3a   :  { %463 = vmatprep.subr.bf16.mxu0 %v601_v0  ;;  %447 = vmatprep.subr.bf16.mxu1 %v601_v0  ;;  %v396_v29 = vld [vmem:[%s712_s4] ss:$0 sm:$0xff] }
  0x3b   :  { %v405_v37 = vld [vmem:[%s714_s6] ss:$0 sm:$0xff] }
  0x3c   :  { %440 = vmatmul.mubr.msk.bf16.vlgmr.msra.gmra.mxu0 %vm105_vm1, %v81_v5 }
  0x3d   :  { %479 = vmatprep.mubr.msk.bf16.mxu0 %vm602_vm0, %v601_v0  ;;  %448 = vmatpush3.bf16.msra.mxu1 %v495_v7 }
  0x3e   :  { %449 = vmatprep.subr.bf16.mxu1 %v601_v0  ;;  %464 = vmatpush3.bf16.msra.mxu0 %v501_v13 }
  0x3f   :  { %465 = vmatprep.subr.bf16.mxu0 %v601_v0 }
  0x41   :  { %450 = vmatpush3.bf16.msra.mxu1 %v496_v8 }
  0x42   :  { %451 = vmatprep.subr.bf16.mxu1 %v601_v0  ;;  %466 = vmatpush3.bf16.msra.mxu0 %v502_v14 }
  0x43   :  { %467 = vmatprep.subr.bf16.mxu0 %v601_v0 }
  0x45   :  { %452 = vmatpush3.bf16.msra.mxu1 %v497_v9 }
  0x46   :  { %453 = vmatprep.subr.bf16.mxu1 %v601_v0  ;;  %468 = vmatpush3.bf16.msra.mxu0 %v503_v15 }
  0x47   :  { %469 = vmatprep.subr.bf16.mxu0 %v601_v0 }
  0x49   :  { %454 = vmatpush3.bf16.msra.mxu1 %v498_v10 }
  0x4a   :  { %455 = vmatprep.subr.bf16.mxu1 %v601_v0  ;;  %470 = vmatpush3.bf16.msra.mxu0 %v504_v16 }
  0x4b   :  { %471 = vmatprep.subr.bf16.mxu0 %v601_v0 }
  0x4d   :  { %456 = vmatpush3.bf16.msra.mxu1 %v499_v11 }
  0x4e   :  { %457 = vmatprep.subr.bf16.mxu1 %v601_v0  ;;  %472 = vmatpush3.bf16.msra.mxu0 %v505_v17 }
  0x4f   :  { %473 = vmatprep.subr.bf16.mxu0 %v601_v0 }
  0x51   :  { %458 = vmatpush3.bf16.msra.mxu1 %v500_v12 }
  0x52   :  { %474 = vmatpush3.bf16.msra.mxu0 %v506_v18 }
  0x53   :  { %475 = vmatprep.subr.bf16.mxu0 %v601_v0 }
  0x56   :  { %476 = vmatpush3.bf16.msra.mxu0 %v507_v27 }
  0x57   :  { %477 = vmatprep.subr.bf16.mxu0 %v601_v0 }
  0x5a   :  { %478 = vmatpush3.bf16.msra.mxu0 %v508_v28 }
  0xfc   :  { %v143_v20 = vpop.f32.mrf.mxu0 }
  0xfd   :  { %v144_v21 = vadd.f32 %v392_v19, %v143_v20 }
  0xfe   :  { %v441_v22 = vpop.f32.mrf.mxu0 }
  0xff   :  { %v149_v23 = vmax.f32 %v144_v21, 0.0 }
 0x100   :  { %v146_v24 = vpop.f32.mrf.mxu0 }
 0x101   :  { %v150_v25 = vpack.c.bf16 %v149_v23, %v149_v23 }
 0x102   :  { %v442_v26 = vpop.f32.mrf.mxu0 }
 0x103   :  { %460 = vmatmul.mubr.bf16.vlgmr.msra.gmra.mxu1 %v150_v25 }
 0x1c3   :  { %v256_v30 = vpop.f32.mrf.mxu1 }
 0x1c4   :  { %v257_v31 = vadd.f32 %v396_v29, %v256_v30 }
 0x1c5   :  { %v461_v32 = vpop.f32.mrf.mxu1 }
 0x1c6   :  { %v262_v33 = vmax.f32 %v257_v31, 0.0 }
 0x1c7   :  { %v259_v34 = vpop.f32.mrf.mxu1 }
 0x1c8   :  { %264 = vst.msk [vmem:[%s715_s7] sm:$0xff] %vm263_vm2, %v262_v33  ;;  %v265_v35 = vpack.c.bf16 %v262_v33, %v262_v33 }
 0x1c9   :  { %v462_v36 = vpop.f32.mrf.mxu1 }
 0x1ca   :  { %480 = vmatmul.mubr.bf16.vlgmr.msra.gmra.mxu0 %v265_v35 }
 0x28a   :  { %v371_v38 = vpop.f32.mrf.mxu0 }
 0x28b   :  { %v372_v39 = vadd.f32 %v405_v37, %v371_v38 }
 0x28c   :  { %v481_v40 = vpop.f32.mrf.mxu0 }
 0x28d   :  { %378 = vrot.lane.b32.xlu0 %v372_v39, %s596_s27 }
 0x28e   :  { %v374_v41 = vpop.f32.mrf.mxu0 }
 0x290   :  { %v482_v42 = vpop.f32.mrf.mxu0 }
 0x2ff   :  { %v379_v43 = vpop.permute.xlu0 %378 }
 0x300   :  { %382 = vst.msk [vmem:[%s715_s7] sm:$0xff] %vm381_vm3, %v379_v43 }
 0x301   :  { %384 = vst.msk [vmem:[%s715_s7] sm:$0xff] %vm383_vm4, %v601_v0 }
 0x302   :  { %389 = vsyncpa [#allocation3], 1 }
 0x303   :  { %390 = vsyncpa [#allocation5], 1 }
 0x304   :  { %391 = vsyncpa [#allocation8], 1 }

</bundles_post_ra>
